<compile_context>
chip_gen: v7x
topology: tpu7x:2x2x1
jax: 0.10.0
libtpu: 0.0.40
codegen_flags: <defaults>
</compile_context>

<pallas_src>
import functools

import jax
import jax.numpy as jnp
from jax.experimental import pallas as pl
from jax.experimental.pallas import tpu as pltpu


# ----------------------------- helpers --------------------------------------

def _round_up(a: int, b: int) -> int:
    return (a + b - 1) // b * b


_MIB = 1024 * 1024
# Portable per-call VMEM budgets: safe on v5e/v6e (128 MiB physical) and on
# v7x (64 MiB physical per TensorCore), leaving headroom for compiler scratch.
_WHOLE_BUDGET = 8 * _MIB     # fold all samples into one block below this
_FUSED_BUDGET = 40 * _MIB    # one-sample-per-step fused path below this


def _vmem_limit(bytes_needed: int) -> int:
    # Explicit scoped-VMEM limit sized from the actual (double-buffered) block
    # footprint + headroom, capped so it stays safe on v7x's 64 MiB VMEM.
    return int(min(max(bytes_needed + 2 * _MIB, 32 * _MIB), 48 * _MIB))


# ----------------------- fused single-pass kernel ----------------------------

def _fused_kernel(x_ref, w_ref, o_ref, *, inv_hw):
    # x_ref: (Nb, C, HW)   w_ref: (C, C)   o_ref: (Nb, C, HW)
    # AdaptiveAvgPool2d((1,1)): per-channel mean over the (lane) spatial axis.
    sums = jnp.sum(x_ref[...].astype(jnp.float32), axis=2)            # (Nb, C)
    means = sums * inv_hw                                             # (Nb, C)
    # 1x1 conv, no bias == channel-mixing matmul: s[b,o] = sum_c W[o,c]*mean[b,c]
    # (HBM-bound kernel -> this tiny MXU matvec is free filler.)
    s = jnp.einsum("bc,oc->bo", means, w_ref[...].astype(jnp.float32),
                   preferred_element_type=jnp.float32)                # (Nb, C)
    gates = jax.nn.sigmoid(s)                                         # (Nb, C)
    # Re-read x from VMEM for the multiply instead of keeping the whole slab
    # live in vregs across the reduction (avoids spill-bound behavior; VMEM
    # re-reads ride the spare vld slots).
    o_ref[...] = (x_ref[...].astype(jnp.float32)
                  * gates[:, :, None]).astype(o_ref.dtype)


def _channel_op_fused(x, weight, nb):
    # x: (N, C, HW); nb in {N, 1} so nb always divides N.
    N, C, HW = x.shape
    itemsize = jnp.dtype(x.dtype).itemsize
    # Double-buffered input + output blocks + (double-buffered) weight.
    # NOTE: weight could use pipeline_mode=pl.Buffered(1) (constant index_map);
    # left at default buffering since C*C here is tiny.
    block_bytes = 4 * nb * C * HW * itemsize + 2 * C * C * jnp.dtype(weight.dtype).itemsize

    kernel = functools.partial(_fused_kernel, inv_hw=1.0 / float(HW))
    return pl.pallas_call(
        kernel,
        out_shape=jax.ShapeDtypeStruct((N, C, HW), x.dtype),
        grid_spec=pltpu.PrefetchScalarGridSpec(
            num_scalar_prefetch=0,
            grid=(N // nb,),
            in_specs=[
                pl.BlockSpec((nb, C, HW), lambda n: (n, 0, 0)),
                pl.BlockSpec((C, C), lambda n: (0, 0)),
            ],
            out_specs=pl.BlockSpec((nb, C, HW), lambda n: (n, 0, 0)),
        ),
        compiler_params=pltpu.CompilerParams(
            dimension_semantics=("parallel",),
            vmem_limit_bytes=_vmem_limit(block_bytes),
        ),
    )(x, weight)


# --------------------------- two-pass kernels --------------------------------

def _row_sum_kernel(x_ref, s_ref):
    # x_ref: (tr, thw)   s_ref: (tr, 1) f32, VMEM-resident across the HW axis.
    @pl.when(pl.program_id(1) == 0)
    def _():
        s_ref[...] = jnp.zeros_like(s_ref)
    s_ref[...] += jnp.sum(x_ref[...].astype(jnp.float32), axis=1, keepdims=True)


def _gate_mul_kernel(g_ref, x_ref, o_ref):
    # g_ref: (tr, 1) f32   x_ref/o_ref: (tr, thw)
    o_ref[...] = (x_ref[...].astype(jnp.float32) * g_ref[...]).astype(o_ref.dtype)


def _channel_op_two_pass(x, weight):
    # x: (N, C, HW) -> returns (N, C, HW)
    N, C, HW = x.shape
    NR = N * C
    x2 = x.reshape(NR, HW)
    itemsize = jnp.dtype(x.dtype).itemsize

    # Lane-dense tiles: last dim a multiple of 128, >= 512 when HW allows.
    thw = 512 if HW >= 512 else _round_up(HW, 128)
    tr = min(256, _round_up(NR, 8))
    HWp = _round_up(HW, thw)
    NRp = _round_up(NR, tr)
    if HWp != HW or NRp != NR:
        x2 = jnp.pad(x2, ((0, NRp - NR), (0, HWp - HW)))

    nr_t = NRp // tr
    nhw_t = HWp // thw

    # ---- Pass 1: per-(N,C) spatial sums (padding-safe: zeros add nothing) ---
    sum_block_bytes = 2 * (tr * thw * itemsize) + 2 * (tr * 4)
    sums = pl.pallas_call(
        _row_sum_kernel,
        out_shape=jax.ShapeDtypeStruct((NRp, 1), jnp.float32),
        grid_spec=pltpu.PrefetchScalarGridSpec(
            num_scalar_prefetch=0,
            grid=(nr_t, nhw_t),
            in_specs=[pl.BlockSpec((tr, thw), lambda r, h: (r, h))],
            out_specs=pl.BlockSpec((tr, 1), lambda r, h: (r, 0)),
        ),
        compiler_params=pltpu.CompilerParams(
            dimension_semantics=("parallel", "arbitrary"),
            vmem_limit_bytes=_vmem_limit(sum_block_bytes),
        ),
    )(x2)

    # ---- Gates (tiny): one batched (N,C)x(C,C)^T matmul + sigmoid in JAX ----
    means = sums[:NR, 0].reshape(N, C) * (1.0 / float(HW))  # sum / true HW
    gates = jax.nn.sigmoid(
        jnp.dot(means, weight.astype(jnp.float32).T,
                preferred_element_type=jnp.float32))          # (N, C)
    g2 = gates.reshape(NR, 1)
    if NRp != NR:
        g2 = jnp.pad(g2, ((0, NRp - NR), (0, 0)))

    # ---- Pass 2: lane-dense tiled broadcast-multiply, fully parallel grid ---
    mul_block_bytes = 4 * (tr * thw * itemsize) + 2 * (tr * 4)
    out2 = pl.pallas_call(
        _gate_mul_kernel,
        out_shape=jax.ShapeDtypeStruct((NRp, HWp), x2.dtype),
        grid_spec=pltpu.PrefetchScalarGridSpec(
            num_scalar_prefetch=0,
            grid=(nr_t, nhw_t),
            in_specs=[
                pl.BlockSpec((tr, 1), lambda r, h: (r, 0)),
                pl.BlockSpec((tr, thw), lambda r, h: (r, h)),
            ],
            out_specs=pl.BlockSpec((tr, thw), lambda r, h: (r, h)),
        ),
        compiler_params=pltpu.CompilerParams(
            dimension_semantics=("parallel", "parallel"),
            vmem_limit_bytes=_vmem_limit(mul_block_bytes),
        ),
    )(g2, x2)

    return out2[:NR, :HW].reshape(N, C, HW)


# ------------------------------ entry point ----------------------------------

def channel_operation(x_nchw, weight, *, force_two_pass=False):
    """x_nchw: (N, C, H, W).  weight: (C, C) (Conv2d 1x1 kernel, squeezed)."""
    N, C, H, W = x_nchw.shape
    HW = H * W
    x = x_nchw.reshape(N, C, HW)
    itemsize = jnp.dtype(x.dtype).itemsize
    w_bytes = 2 * C * C * jnp.dtype(weight.dtype).itemsize

    per_sample = C * HW * itemsize
    whole_need = 4 * N * per_sample + w_bytes    # in+out blocks, double-buffered
    sample_need = 4 * per_sample + w_bytes

    if force_two_pass:
        out = _channel_op_two_pass(x, weight)
    elif whole_need <= _WHOLE_BUDGET:
        out = _channel_op_fused(x, weight, nb=N)   # all samples in one block/step
    elif sample_need <= _FUSED_BUDGET:
        out = _channel_op_fused(x, weight, nb=1)   # one sample per grid step
    else:
        out = _channel_op_two_pass(x, weight)      # slab too big (e.g. v7x VMEM)
    return out.reshape(N, C, H, W)


def reference(x_nchw, weight):
    # Pure-JAX reference of the PyTorch forward.
    mean = jnp.mean(x_nchw, axis=(2, 3))                       # (N, C)
    s = jnp.einsum("oc,nc->no", weight, mean)                  # (N, C)
    gate = jax.nn.sigmoid(s)[:, :, None, None]                 # (N, C, 1, 1)
    return x_nchw * gate


if __name__ == "__main__":
    N, C, H, W = 2, 4, 16, 16

    key = jax.random.PRNGKey(0)
    kx, kw = jax.random.split(key)
    x = jax.random.normal(kx, (N, C, H, W), dtype=jnp.float32)
    # Conv2d(dim, dim, 1, 1, 0, bias=False) weight is (C, C, 1, 1); we keep (C, C).
    weight = 0.3 * jax.random.normal(kw, (C, C), dtype=jnp.float32)

    ref = reference(x, weight)

    # Fast path: fused single pass (whole problem folded into one VMEM block).
    out = jax.block_until_ready(channel_operation(x, weight))
    assert out.shape == (N, C, H, W)
    assert jnp.allclose(out, ref, atol=1e-5, rtol=1e-5), "fused path mismatch"

    # Also exercise the tiled two-pass path used when C*HW exceeds the VMEM budget.
    out2 = jax.block_until_ready(channel_operation(x, weight, force_two_pass=True))
    assert jnp.allclose(out2, ref, atol=1e-5, rtol=1e-5), "two-pass path mismatch"

    print("KERNEL_OK")
</pallas_src>

<mosaic_0001>
module attributes {stable_mosaic.version = 11 : i64} {
  func.func @_fused_kernel(%arg0: i32, %arg1: memref<2x4x256xf32, #tpu.memory_space<vmem>>, %arg2: memref<4x4xf32, #tpu.memory_space<vmem>>, %arg3: memref<2x4x256xf32, #tpu.memory_space<vmem>>) attributes {dimension_semantics = [#tpu.dimension_semantics<parallel>], iteration_bounds = array<i64: 1>, scalar_prefetch = 0 : i64, scratch_operands = 0 : i64, tpu.core_type = #tpu.core_type<tc>, window_params = [{transform_indices = @transform_0, window_bounds = array<i64: 2, 4, 256>}, {pipeline_mode = #tpu.pipeline_mode<synchronous>, transform_indices = @transform_1, window_bounds = array<i64: 4, 4>}, {transform_indices = @transform_2, window_bounds = array<i64: 2, 4, 256>}]} {
    %c0 = arith.constant 0 : index
    %c0_0 = arith.constant 0 : index
    %c0_1 = arith.constant 0 : index
    %0 = vector.load %arg1[%c0, %c0_0, %c0_1] : memref<2x4x256xf32, #tpu.memory_space<vmem>>, vector<2x4x256xf32>
    %cst = arith.constant dense<0.000000e+00> : vector<2x4xf32>
    %1 = vector.multi_reduction <add>, %0, %cst [2] : vector<2x4x256xf32> to vector<2x4xf32>
    %cst_2 = arith.constant 3.906250e-03 : f32
    %2 = vector.broadcast %cst_2 : f32 to vector<2x4xf32>
    %3 = arith.mulf %1, %2 : vector<2x4xf32>
    %c0_3 = arith.constant 0 : index
    %c0_4 = arith.constant 0 : index
    %4 = vector.load %arg2[%c0_3, %c0_4] : memref<4x4xf32, #tpu.memory_space<vmem>>, vector<4x4xf32>
    "tpu.trace_start"() <{level = 10 : i32, message = "bc,oc->bo"}> : () -> ()
    %cst_5 = arith.constant dense<0.000000e+00> : vector<2x4xf32>
    %5 = tpu.matmul %3, %4, %cst_5 {dimension_numbers = #tpu.dot_dimension_numbers<[1], [1], [0], [0], [0, 0, 1, 0], [], []>} : vector<2x4xf32>, vector<4x4xf32>, vector<2x4xf32> -> vector<2x4xf32>
    "tpu.trace_stop"() : () -> ()
    %6 = arith.negf %5 : vector<2x4xf32>
    %7 = math.exp %6 : vector<2x4xf32>
    %cst_6 = arith.constant 1.000000e+00 : f32
    %8 = vector.broadcast %cst_6 : f32 to vector<2x4xf32>
    %9 = arith.addf %8, %7 : vector<2x4xf32>
    %10 = arith.divf %8, %9 : vector<2x4xf32>
    %c0_7 = arith.constant 0 : index
    %c0_8 = arith.constant 0 : index
    %c0_9 = arith.constant 0 : index
    %11 = vector.load %arg1[%c0_7, %c0_8, %c0_9] : memref<2x4x256xf32, #tpu.memory_space<vmem>>, vector<2x4x256xf32>
    %12 = vector.shape_cast %10 : vector<2x4xf32> to vector<2x4x1xf32>
    %13 = vector.broadcast %12 : vector<2x4x1xf32> to vector<2x4x256xf32>
    %14 = arith.mulf %11, %13 : vector<2x4x256xf32>
    %c0_10 = arith.constant 0 : index
    %c0_11 = arith.constant 0 : index
    %c0_12 = arith.constant 0 : index
    %15 = vector.load %arg3[%c0_10, %c0_11, %c0_12] : memref<2x4x256xf32, #tpu.memory_space<vmem>>, vector<2x4x256xf32>
    tpu.vector_store %arg3[%c0_10, %c0_11, %c0_12], %14 {strides = array<i32>} : memref<2x4x256xf32, #tpu.memory_space<vmem>>, vector<2x4x256xf32>,
    return
  }
  func.func @transform_0(%arg0: i32) -> (i32, i32, i32) {
    %c0_i32 = arith.constant 0 : i32
    %c0_i32_0 = arith.constant 0 : i32
    %c0_i32_1 = arith.constant 0 : i32
    return %arg0, %c0_i32, %c0_i32_0 : i32, i32, i32
  }
  func.func @transform_1(%arg0: i32) -> (i32, i32) {
    %c0_i32 = arith.constant 0 : i32
    %c0_i32_0 = arith.constant 0 : i32
    %c0_i32_1 = arith.constant 0 : i32
    return %c0_i32, %c0_i32_0 : i32, i32
  }
  func.func @transform_2(%arg0: i32) -> (i32, i32, i32) {
    %c0_i32 = arith.constant 0 : i32
    %c0_i32_0 = arith.constant 0 : i32
    %c0_i32_1 = arith.constant 0 : i32
    return %arg0, %c0_i32, %c0_i32_0 : i32, i32, i32
  }
}

</mosaic_0001>

<bundles_post_ra>
// kernel: tpu_custom_call.1
= control target key start
LH: loop header
LB: loop body
LE: loop exit
PB: predicated region body
PF: predicated region fallthrough
CT: control target
= control target key end

     0   :  { %7 = vsyncpa [#allocation3], 0  ;;  %s375_s0 = inlined_call_operand.hbm [shape: f32[2,4,256], index: 0, kind: input, shape index: {}]   ;;  %s376_s1 = inlined_call_operand.hbm [shape: f32[4,4], index: 1, kind: input, shape index: {}]   ;;  %s377_s2 = inlined_call_operand.hbm [shape: f32[2,4,256], index: 2, kind: output, shape index: {}]  }
   0x1   :  { %8 = vsyncpa [#allocation6], 0 }
   0x2   :  { %9 = vsyncpa [#allocation4], 0  ;;  %s308_s9 = smov [#allocation2]   ;;  %s236_s13 = scalar_lea.hbm %s375_s0, 256 }
   0x3   :  { %s15_s10 = sshll.u32 %s308_s9, 4  ;;  %p237_p0 = scmp.ne.s32.totalorder %s375_s0, %s236_s13  ;;  %s16_s10 = int_to_ptr.vmem [resolvable:$true] %s15_s10 }
   0x4   :  { %p240_p1 = scmp.lt.u32.totalorder %s236_s13, %s375_s0 }
   0x6   :  { %p242_p2 = pnand %p240_p1, %p237_p0 }
   0x8   :  { %245 = shalt.err (!%p242_p2)
}
   0x9   :  { %s246_s18 = scalar_lea.vmem %s16_s10, 256  ;;  %p251_p4 = scmp.lt.s32.totalorder %s16_s10, %s16_s10 }
   0xa   :  { %p247_p3 = scmp.ne.s32.totalorder %s16_s10, %s246_s18  ;;  %p252_p5 = scmp.lt.s32.totalorder %s246_s18, %s246_s18 }
   0xc   :  { %p253_p6 = por %p252_p5, %p251_p4 }
   0xe   :  { %p254_p7 = pnand %p253_p6, %p247_p3 }
  0x10   :  { %257 = shalt.err (!%p254_p7)
}
  0x11   :  { %s309_s19 = smov 128   ;;  %s310_s20 = smov 8  }
  0x12   :  { %21 = dma.hbm_to_vmem [thread:$0]  %s375_s0, 256, %s16_s10, [#allocation3], %s309_s19, %s309_s19, %s310_s20  }
  0x13   :  { %s311_s23 = smov [#allocation5]   ;;  %s258_s27 = scalar_lea.hbm %s376_s1, 64 }
  0x14   :  { %s28_s24 = sshll.u32 %s311_s23, 4  ;;  %p259_p8 = scmp.ne.s32.totalorder %s376_s1, %s258_s27  ;;  %s29_s24 = int_to_ptr.vmem [resolvable:$true] %s28_s24 }
  0x15   :  { %p262_p9 = scmp.lt.u32.totalorder %s258_s27, %s376_s1 }
  0x17   :  { %p264_p10 = pnand %p262_p9, %p259_p8 }
  0x19   :  { %267 = shalt.err (!%p264_p10)
}
  0x1a   :  { %s268_s4 = scalar_lea.vmem %s29_s24, 64  ;;  %p273_p12 = scmp.lt.s32.totalorder %s29_s24, %s29_s24 }
  0x1b   :  { %p269_p11 = scmp.ne.s32.totalorder %s29_s24, %s268_s4  ;;  %p274_p13 = scmp.lt.s32.totalorder %s268_s4, %s268_s4 }
  0x1d   :  { %p275_p0 = por %p274_p13, %p273_p12 }
  0x1f   :  { %p276_p1 = pnand %p275_p0, %p269_p11 }
  0x21   :  { %279 = shalt.err (!%p276_p1)
}
  0x22   :  { %31 = dma.hbm_to_vmem [thread:$0]  %s376_s1, 64, %s29_s24, [#allocation6]  }
  0x23   :  { %302 = dma.done.wait [#allocation3], 256  }
  0x24   :  { %303 = vsyncadd [#allocation3], 4294967040 }
  0x25   :  { %304 = dma.done.wait [#allocation6], 64  }
  0x26   :  { %305 = vsyncadd [#allocation6], 4294967232  ;;  %vm46_vm0 = vcmask 1043456   ;;  %v38_v0 = vld [vmem:[#allocation2] sm:$0xff]  ;;  %v39_v1 = vld [vmem:[#allocation2 + $0x8] sm:$0xff]  ;;  %v312_v10 = vmov 0.0   ;;  %v62_v12 = vlaneseq }
  0x27   :  { %v42_v2 = vcombine.high %v38_v0, %v38_v0  ;;  %v47_v3 = vsel %vm46_vm0, %v38_v0, 0.0  ;;  %v43_v4 = vcombine.high %v39_v1, %v39_v1  ;;  %v52_v6 = vsel %vm46_vm0, %v39_v1, 0.0  ;;  %217 = vmatprep.subr.mxu0 %v312_v10  ;;  %v59_v11 = vld [vmem:[#allocation5] sm:$0xf]  ;;  %s315_s1 = smov [#allocation7]  }
  0x28   :  { %vm74_vm1 = vcmask 31744   ;;  %vm313_vm2 = vmmov 0   ;;  %v63_v13 = vand.u32 127, %v62_v12  ;;  %v65_v14 = vshrl.u32 %v62_v12, 7  ;;  %s199_s6 = sshll.u32 %s315_s1, 4  ;;  %s200_s6 = int_to_ptr.vmem [resolvable:$true] %s199_s6 }
  0x29   :  { %v48_v5 = vsel %vm46_vm0, %v42_v2, 0.0  ;;  %v53_v7 = vsel %vm46_vm0, %v43_v4, 0.0  ;;  %218 = vmatpush3.xpose.msk.msra.mxu0 %vm74_vm1, %v59_v11  ;;  %219 = vmatprep.mubr.msk.f32.mxu0 %vm313_vm2, %v312_v10  ;;  %vm72_vm3 = vcmask 1041409   ;;  %v314_v33 = vmov 839922192   ;;  %s280_s7 = scalar_lea.vmem %s200_s6, 256  ;;  %p285_p3 = scmp.lt.s32.totalorder %s200_s6, %s200_s6 }
  0x2a   :  { %v49_v8 = vadd.f32 %v48_v5, %v47_v3  ;;  %v54_v9 = vadd.f32 %v53_v7, %v52_v6  ;;  %v66_v16 = vsub.s32 %v63_v13, %v65_v14  ;;  %v160_v28 = vsub.s32 0, %v65_v14  ;;  %p281_p2 = scmp.ne.s32.totalorder %s200_s6, %s280_s7  ;;  %p286_p4 = scmp.lt.s32.totalorder %s280_s7, %s280_s7 }
  0x2b   :  { %v167_v31 = vsub.s32 1, %v65_v14  ;;  %v175_v34 = vunpack.c.l.s4 %v314_v33 }
  0x2c   :  { %50 = vadd.xlane.f32.xlu0 %v49_v8  ;;  %p287_p5 = por %p286_p4, %p285_p3 }
  0x2d   :  { %v176_v35 = vunpack.c.0.s8 %v175_v34 }
  0x2e   :  { %p288_p6 = pnand %p287_p5, %p281_p2 }
  0x2f   :  { %v179_v36 = vsub.s32 %v176_v35, %v65_v14 }
  0x30   :  { %55 = vadd.xlane.f32.xlu0 %v54_v9 }
  0xb9   :  { %v51_v15 = vpop.xlane.xlu0 %50 }
  0xba   :  { %v57_v17 = vmul.f32 0.00390625, %v51_v15 }
  0xbc   :  { %v67_v20 = vrot.slane %v57_v17, %v66_v16 }
  0xbd   :  { %v56_v18 = vpop.xlane.xlu0 %55 }
  0xbe   :  { %v58_v19 = vmul.f32 0.00390625, %v56_v18 }
  0xc0   :  { %v71_v21 = vrot.slane %v58_v19, %v66_v16 }
  0xc2   :  { %v73_v22 = vsel %vm72_vm3, %v71_v21, %v67_v20 }
  0xc3   :  { %220 = vmatmul.mubr.msk.f32.vlgmr.msra.gmra.mrb[0].mxu0 %vm74_vm1, %v73_v22 }
 0x196   :  { %v146_v23 = vpop.f32.mrb[0].mxu0 }
 0x197   :  { %v214_v24 = vmul.f32 -1.442695, %v146_v23  ;;  %v221_v25 = vpop.f32.mrb[1].mxu0 }
 0x199   :  { %232 = vpow2.f32 %v214_v24 }
 0x1a3   :  { %v233_v26 = vpop.eup %232 }
 0x1a4   :  { %v153_v27 = vadd.f32 1.0, %v233_v26 }
 0x1a6   :  { %234 = vrcp.f32 %v153_v27 }
 0x1b0   :  { %v235_v29 = vpop.eup %234 }
 0x1b1   :  { %v161_v30 = vrot.slane %v235_v29, %v160_v28  ;;  %v168_v32 = vrot.slane %v235_v29, %v167_v31 }
 0x1b3   :  { %163 = vbcast.lane.b32.xlu1 %v161_v30, 256 }
 0x1b7   :  { %170 = vbcast.lane.b32.xlu1 %v168_v32, 256 }
 0x225   :  { %v164_v37 = vpop.permute.xlu1 %163 }
 0x226   :  { %v180_v38 = vrot.slane %v164_v37, %v179_v36 }
 0x228   :  { %v190_v39 = vmul.f32 %v180_v38, %v38_v0 }
 0x229   :  { %v171_v40 = vpop.permute.xlu1 %170 }
 0x22a   :  { %192 = vst [vmem:[#allocation7] sm:$0xff] %v190_v39  ;;  %v187_v41 = vrot.slane %v171_v40, %v179_v36 }
 0x22c   :  { %v191_v42 = vmul.f32 %v187_v41, %v39_v1 }
 0x22e   :  { %193 = vst [vmem:[#allocation7 + $0x8] sm:$0xff] %v191_v42 }
 0x22f   :  { %291 = shalt.err (!%p288_p6)
}
 0x230   :  { %s292_s10 = scalar_lea.hbm %s377_s2, 256 }
 0x231   :  { %p293_p7 = scmp.ne.s32.totalorder %s377_s2, %s292_s10  ;;  %p296_p8 = scmp.lt.u32.totalorder %s292_s10, %s377_s2 }
 0x233   :  { %p298_p9 = pnand %p296_p8, %p293_p7 }
 0x235   :  { %301 = shalt.err (!%p298_p9)
}
 0x236   :  { %205 = dma.vmem_to_hbm [thread:$0]  %s200_s6, 256, %s377_s2, [#allocation4], %s309_s19, %s309_s19, %s310_s20  }
 0x237   :  { %306 = dma.done.wait [#allocation4], 256  }
 0x238   :  { %307 = vsyncadd [#allocation4], 4294967040 }
 0x239   :  { %209 = vsyncpa [#allocation3], 1 }
 0x23a   :  { %210 = vsyncpa [#allocation6], 1 }
 0x23b   :  { %211 = vsyncpa [#allocation4], 1 }

</bundles_post_ra>
